<compile_context>
chip_gen: v5e
topology: v5e:2x2
jax: 0.10.0
libtpu: 0.0.40
codegen_flags: <defaults>
</compile_context>

<pallas_src>
import functools

import jax
import jax.numpy as jnp
from jax.experimental import pallas as pl
from jax.experimental.pallas import tpu as pltpu


# --------------------------- hardware-aware sizing ---------------------------

_DEFAULT_VMEM_BYTES = 128 * 1024 * 1024  # v5e / v6e per-TensorCore VMEM


def _vmem_capacity_bytes():
    try:
        info = pltpu.get_tpu_info()
        cap = getattr(info, "vmem_capacity_bytes", None)
        if cap:
            return int(cap)
    except Exception:
        pass
    return _DEFAULT_VMEM_BYTES


def _vmem_budget():
    """(vmem_limit_bytes for CompilerParams, working-set budget in bytes)."""
    cap = _vmem_capacity_bytes()
    vmem_limit = min(int(cap * 0.75), 100 * 1024 * 1024)   # 96 MiB on 128 MiB parts, 48 MiB on v7x
    working = int(vmem_limit * 0.85)                        # leave compiler scratch headroom
    return vmem_limit, working


def _sublane(dtype):
    """Sublane pack for a dtype: 8 (f32), 16 (bf16), 32 (int8/fp8)."""
    itemsize = jnp.dtype(dtype).itemsize
    return max(8, 32 // max(itemsize, 1))


def _round_up(n, m):
    return ((n + m - 1) // m) * m


def _choose_block_rows(R, per_row_bytes, row_budget, sub, cap=1024):
    """Pick a row-tile size from a VMEM byte budget, sublane-aligned, and with at
    least 2 row tiles when possible (v7x megacore 'parallel' axis)."""
    br = row_budget // max(per_row_bytes, 1)
    br = max(sub, min(cap, (br // sub) * sub))
    br = min(br, _round_up(R, sub))
    if pl.cdiv(R, br) < 2 and br > sub:
        br = max(sub, _round_up(pl.cdiv(R, 2), sub))
    return br


# ----------------------------- LayerNorm kernel -------------------------------
# Generic PostNorm path. Optionally fuses a shape-preserving elementwise fn so the
# intermediate activation never round-trips through HBM.

def _layernorm_kernel(x_ref, g_ref, b_ref, o_ref, *, eps, elementwise_fn):
    x = x_ref[...].astype(jnp.float32)                        # (rows, D)
    if elementwise_fn is not None:
        x = elementwise_fn(x)
    mean = jnp.mean(x, axis=-1, keepdims=True)
    msq = jnp.mean(x * x, axis=-1, keepdims=True)
    var = jnp.maximum(msq - mean * mean, 0.0)                 # biased var (nn.LayerNorm)
    inv = jax.lax.rsqrt(var + eps)
    y = (x - mean) * inv * g_ref[...] + b_ref[...]
    o_ref[...] = y.astype(o_ref.dtype)


def layernorm_pallas(x2d, gamma, beta, *, eps=1e-5, elementwise_fn=None):
    R, D = x2d.shape
    sub = _sublane(x2d.dtype)
    itemsize = jnp.dtype(x2d.dtype).itemsize
    vmem_limit, budget = _vmem_budget()

    # double-buffered input + double-buffered output + f32 working copies
    per_row = 2 * D * itemsize + 2 * D * itemsize + 2 * D * 4
    block_rows = _choose_block_rows(R, per_row, budget, sub)
    grid = (pl.cdiv(R, block_rows),)

    g2 = gamma.reshape(1, D).astype(jnp.float32)
    b2 = beta.reshape(1, D).astype(jnp.float32)

    return pl.pallas_call(
        functools.partial(_layernorm_kernel, eps=eps, elementwise_fn=elementwise_fn),
        out_shape=jax.ShapeDtypeStruct((R, D), x2d.dtype),
        grid_spec=pltpu.PrefetchScalarGridSpec(
            num_scalar_prefetch=0,
            grid=grid,
            in_specs=[
                pl.BlockSpec((block_rows, D), lambda i: (i, 0)),
                pl.BlockSpec((1, D), lambda i: (0, 0)),
                pl.BlockSpec((1, D), lambda i: (0, 0)),
            ],
            out_specs=pl.BlockSpec((block_rows, D), lambda i: (i, 0)),
        ),
        compiler_params=pltpu.CompilerParams(
            dimension_semantics=("parallel",),
            vmem_limit_bytes=vmem_limit),
    )(x2d, g2, b2)


# --------------------- Fused Linear + PostNorm kernels ------------------------
# y = x @ w + b followed by LayerNorm(y)*gamma + beta, in a single pallas_call.

def _linear_postnorm_resident_kernel(x_ref, w_ref, b_ref, g_ref, beta_ref, o_ref, *, eps):
    # bf16 MXU operands, f32 accumulation.
    y = jnp.dot(x_ref[...].astype(jnp.bfloat16),
                w_ref[...].astype(jnp.bfloat16),
                preferred_element_type=jnp.float32) + b_ref[...]
    mean = jnp.mean(y, axis=-1, keepdims=True)
    msq = jnp.mean(y * y, axis=-1, keepdims=True)
    var = jnp.maximum(msq - mean * mean, 0.0)
    inv = jax.lax.rsqrt(var + eps)
    out = (y - mean) * inv * g_ref[...] + beta_ref[...]
    o_ref[...] = out.astype(o_ref.dtype)


def _linear_postnorm_ktiled_kernel(x_ref, w_ref, b_ref, g_ref, beta_ref, o_ref, acc_ref,
                                   *, eps):
    k = pl.program_id(1)

    @pl.when(k == 0)
    def _():
        acc_ref[...] = jnp.zeros_like(acc_ref)

    acc_ref[...] += jnp.dot(x_ref[...].astype(jnp.bfloat16),
                            w_ref[...].astype(jnp.bfloat16),
                            preferred_element_type=jnp.float32)

    @pl.when(k == pl.num_programs(1) - 1)
    def _():
        y = acc_ref[...] + b_ref[...]
        mean = jnp.mean(y, axis=-1, keepdims=True)
        msq = jnp.mean(y * y, axis=-1, keepdims=True)
        var = jnp.maximum(msq - mean * mean, 0.0)
        inv = jax.lax.rsqrt(var + eps)
        out = (y - mean) * inv * g_ref[...] + beta_ref[...]
        o_ref[...] = out.astype(o_ref.dtype)


def linear_postnorm_pallas(x2d, w, b, gamma, beta, *, eps=1e-5):
    R, Din = x2d.shape
    Din_w, Dout = w.shape
    assert Din == Din_w

    x_itemsize = jnp.dtype(x2d.dtype).itemsize
    sub = _sublane(x2d.dtype)
    vmem_limit, budget = _vmem_budget()

    b2 = b.reshape(1, Dout).astype(jnp.float32)
    g2 = gamma.reshape(1, Dout).astype(jnp.float32)
    be2 = beta.reshape(1, Dout).astype(jnp.float32)

    w_bytes = Din * Dout * jnp.dtype(w.dtype).itemsize

    # ---- resident-weight path: whole W stays in VMEM across all row tiles ----
    if 2 * w_bytes <= budget // 2:
        row_budget = budget - 2 * w_bytes
        # 2x x buffers, 2x out buffers, f32 y + LN temps per row.
        per_row = 2 * Din * x_itemsize + 2 * Dout * x_itemsize + 2 * Dout * 4
        block_rows = _choose_block_rows(R, per_row, row_budget, sub)
        grid = (pl.cdiv(R, block_rows),)
        return pl.pallas_call(
            functools.partial(_linear_postnorm_resident_kernel, eps=eps),
            out_shape=jax.ShapeDtypeStruct((R, Dout), x2d.dtype),
            grid_spec=pltpu.PrefetchScalarGridSpec(
                num_scalar_prefetch=0,
                grid=grid,
                in_specs=[
                    pl.BlockSpec((block_rows, Din), lambda i: (i, 0)),
                    pl.BlockSpec((Din, Dout), lambda i: (0, 0)),   # resident weight
                    pl.BlockSpec((1, Dout), lambda i: (0, 0)),
                    pl.BlockSpec((1, Dout), lambda i: (0, 0)),
                    pl.BlockSpec((1, Dout), lambda i: (0, 0)),
                ],
                out_specs=pl.BlockSpec((block_rows, Dout), lambda i: (i, 0)),
            ),
            compiler_params=pltpu.CompilerParams(
                dimension_semantics=("parallel",),
                vmem_limit_bytes=vmem_limit),
        )(x2d, w, b2, g2, be2)

    # ---- streamed-weight path: K-tiled grid with an f32 VMEM accumulator ----
    # Cast W to bf16 once in the wrapper: halves the repeated per-row-tile streaming.
    w_in = w.astype(jnp.bfloat16)
    if Din % 512 == 0:
        block_k = 512
    elif Din % 256 == 0:
        block_k = 256
    elif Din % 128 == 0:
        block_k = 128
    else:
        block_k = Din
    fixed = 2 * block_k * Dout * 2                       # double-buffered bf16 weight tile
    per_row = (2 * block_k * x_itemsize + 2 * Dout * x_itemsize
               + 2 * Dout * 4 + Dout * 4)                # x, out, acc + LN temps
    row_budget = max(budget - fixed, budget // 4)
    block_rows = _choose_block_rows(R, per_row, row_budget, sub)
    grid = (pl.cdiv(R, block_rows), Din // block_k)
    return pl.pallas_call(
        functools.partial(_linear_postnorm_ktiled_kernel, eps=eps),
        out_shape=jax.ShapeDtypeStruct((R, Dout), x2d.dtype),
        grid_spec=pltpu.PrefetchScalarGridSpec(
            num_scalar_prefetch=0,
            grid=grid,
            in_specs=[
                pl.BlockSpec((block_rows, block_k), lambda i, k: (i, k)),
                pl.BlockSpec((block_k, Dout), lambda i, k: (k, 0)),
                pl.BlockSpec((1, Dout), lambda i, k: (0, 0)),
                pl.BlockSpec((1, Dout), lambda i, k: (0, 0)),
                pl.BlockSpec((1, Dout), lambda i, k: (0, 0)),
            ],
            out_specs=pl.BlockSpec((block_rows, Dout), lambda i, k: (i, 0)),
            scratch_shapes=[pltpu.VMEM((block_rows, Dout), jnp.float32)],
        ),
        compiler_params=pltpu.CompilerParams(
            dimension_semantics=("parallel", "arbitrary"),
            vmem_limit_bytes=vmem_limit),
    )(x2d, w_in, b2, g2, be2)


# --------------------------------- PostNorm -----------------------------------

class PallasLinear:
    """Linear(dim_in -> dim_out) parameters. When wrapped by PostNorm the matmul is
    fused with the LayerNorm into a single Pallas kernel."""

    def __init__(self, w, b):
        self.w = w
        self.b = b
        self.out_dim = w.shape[1]

    def __call__(self, x):
        return jnp.einsum("btd,de->bte", x, self.w) + self.b


class PallasElementwise:
    """Marks fn as a shape-preserving elementwise op so PostNorm fuses it directly
    into the LayerNorm kernel (one HBM read + one write instead of four)."""

    def __init__(self, fn):
        self.fn = fn

    def __call__(self, x):
        return self.fn(x)


class PostNorm:
    """JAX/Pallas mirror of the PyTorch PostNorm module: norm(fn(x, **kwargs)).
    norm = nn.LayerNorm(dim) (elementwise affine, eps=1e-5)."""

    def __init__(self, dim, fn, eps=1e-5):
        self.dim = dim
        self.fn = fn
        self.eps = eps
        # nn.LayerNorm default init: weight=1, bias=0.
        self.gamma = jnp.ones((dim,), jnp.float32)
        self.beta = jnp.zeros((dim,), jnp.float32)

    def __call__(self, x, **kwargs):
        # Fused Linear + LayerNorm fast path.
        if isinstance(self.fn, PallasLinear) and self.fn.out_dim == self.dim and not kwargs:
            B, T, Din = x.shape
            out = linear_postnorm_pallas(
                x.reshape(B * T, Din), self.fn.w, self.fn.b,
                self.gamma, self.beta, eps=self.eps)
            return out.reshape(B, T, self.dim)
        # Elementwise fn fused into the LayerNorm kernel.
        if isinstance(self.fn, PallasElementwise) and not kwargs:
            B, T, D = x.shape
            assert D == self.dim
            out = layernorm_pallas(x.reshape(B * T, D), self.gamma, self.beta,
                                   eps=self.eps, elementwise_fn=self.fn.fn)
            return out.reshape(B, T, D)
        # TODO(synk): arbitrary fns (attention/MLP blocks, kwargs) run as plain JAX;
        # only the trailing LayerNorm is a Pallas kernel.
        y = self.fn(x, **kwargs)
        B, T, D = y.shape
        assert D == self.dim
        out = layernorm_pallas(y.reshape(B * T, D), self.gamma, self.beta, eps=self.eps)
        return out.reshape(B, T, D)


# ----------------------------------- main ------------------------------------

if __name__ == "__main__":
    B, T, D = 2, 8, 32  # small shapes: batch=2, seq=8, hidden(dim)=32
    key = jax.random.PRNGKey(0)
    kx, kw, kb, kg, kbe = jax.random.split(key, 5)

    x = jax.random.normal(kx, (B, T, D), jnp.float32)
    w = jax.random.normal(kw, (D, D), jnp.float32) * 0.02
    b = jax.random.normal(kb, (D,), jnp.float32) * 0.02

    postnorm = PostNorm(D, PallasLinear(w, b))
    # Non-default affine params so gamma/beta paths are actually exercised.
    postnorm.gamma = 1.0 + 0.1 * jax.random.normal(kg, (D,), jnp.float32)
    postnorm.beta = 0.1 * jax.random.normal(kbe, (D,), jnp.float32)

    out = postnorm(x)
    jax.block_until_ready(out)

    def ln_ref(y, g, be, eps=1e-5):
        m = jnp.mean(y, axis=-1, keepdims=True)
        v = jnp.mean((y - m) ** 2, axis=-1, keepdims=True)
        return (y - m) / jnp.sqrt(v + eps) * g + be

    # f32 reference of the PyTorch module (loose tol: kernel feeds the MXU bf16 operands).
    ref_f32 = ln_ref(jnp.einsum("btd,de->bte", x, w) + b, postnorm.gamma, postnorm.beta)
    assert out.shape == ref_f32.shape
    assert jnp.allclose(out, ref_f32, atol=5e-2, rtol=5e-2), \
        float(jnp.max(jnp.abs(out - ref_f32)))

    # bf16-operand reference (tight tol: isolates any real kernel bug from bf16 rounding).
    xb = x.astype(jnp.bfloat16).astype(jnp.float32)
    wb = w.astype(jnp.bfloat16).astype(jnp.float32)
    ref_bf = ln_ref(jnp.einsum("btd,de->bte", xb, wb) + b, postnorm.gamma, postnorm.beta)
    assert jnp.allclose(out, ref_bf, atol=2e-3, rtol=2e-3), \
        float(jnp.max(jnp.abs(out - ref_bf)))

    # Fused elementwise path (tanh folded into the LayerNorm kernel).
    postnorm_tanh = PostNorm(D, PallasElementwise(jnp.tanh))
    postnorm_tanh.gamma = postnorm.gamma
    postnorm_tanh.beta = postnorm.beta
    out2 = postnorm_tanh(x)
    jax.block_until_ready(out2)
    ref2 = ln_ref(jnp.tanh(x), postnorm.gamma, postnorm.beta)
    assert jnp.allclose(out2, ref2, atol=1e-4, rtol=1e-3), \
        float(jnp.max(jnp.abs(out2 - ref2)))

    # Generic (unfused) path: arbitrary fn as plain JAX, then the LayerNorm kernel.
    postnorm_generic = PostNorm(D, lambda z: z * jax.nn.sigmoid(z))
    out3 = postnorm_generic(x)
    jax.block_until_ready(out3)
    ref3 = ln_ref(x * jax.nn.sigmoid(x), jnp.ones((D,), jnp.float32),
                  jnp.zeros((D,), jnp.float32))
    assert jnp.allclose(out3, ref3, atol=1e-4, rtol=1e-3)

    print("KERNEL_OK")
</pallas_src>

<mosaic_0001>
module attributes {stable_mosaic.version = 11 : i64} {
  func.func @_linear_postnorm_resident_kernel(%arg0: i32, %arg1: memref<8x32xf32, #tpu.memory_space<vmem>>, %arg2: memref<32x32xf32, #tpu.memory_space<vmem>>, %arg3: memref<1x32xf32, #tpu.memory_space<vmem>>, %arg4: memref<1x32xf32, #tpu.memory_space<vmem>>, %arg5: memref<1x32xf32, #tpu.memory_space<vmem>>, %arg6: memref<8x32xf32, #tpu.memory_space<vmem>>) attributes {dimension_semantics = [#tpu.dimension_semantics<parallel>], iteration_bounds = array<i64: 2>, scalar_prefetch = 0 : i64, scratch_operands = 0 : i64, tpu.core_type = #tpu.core_type<tc>, window_params = [{transform_indices = @transform_0, window_bounds = array<i64: 8, 32>}, {pipeline_mode = #tpu.pipeline_mode<synchronous>, transform_indices = @transform_1, window_bounds = array<i64: 32, 32>}, {pipeline_mode = #tpu.pipeline_mode<synchronous>, transform_indices = @transform_2, window_bounds = array<i64: 1, 32>}, {pipeline_mode = #tpu.pipeline_mode<synchronous>, transform_indices = @transform_3, window_bounds = array<i64: 1, 32>}, {pipeline_mode = #tpu.pipeline_mode<synchronous>, transform_indices = @transform_4, window_bounds = array<i64: 1, 32>}, {transform_indices = @transform_5, window_bounds = array<i64: 8, 32>}]} {
    %c0 = arith.constant 0 : index
    %c0_0 = arith.constant 0 : index
    %0 = vector.load %arg1[%c0, %c0_0] : memref<8x32xf32, #tpu.memory_space<vmem>>, vector<8x32xf32>
    %1 = arith.truncf %0 : vector<8x32xf32> to vector<8x32xbf16>
    %c0_1 = arith.constant 0 : index
    %c0_2 = arith.constant 0 : index
    %2 = vector.load %arg2[%c0_1, %c0_2] : memref<32x32xf32, #tpu.memory_space<vmem>>, vector<32x32xf32>
    %3 = arith.truncf %2 : vector<32x32xf32> to vector<32x32xbf16>
    %cst = arith.constant dense<0.000000e+00> : vector<8x32xf32>
    %4 = tpu.matmul %1, %3, %cst {dimension_numbers = #tpu.dot_dimension_numbers<[1], [0], [0], [1], [0, 0, 1, 1], [], []>} : vector<8x32xbf16>, vector<32x32xbf16>, vector<8x32xf32> -> vector<8x32xf32>
    %c0_3 = arith.constant 0 : index
    %c0_4 = arith.constant 0 : index
    %5 = vector.load %arg3[%c0_3, %c0_4] : memref<1x32xf32, #tpu.memory_space<vmem>>, vector<1x32xf32>
    %6 = vector.broadcast %5 : vector<1x32xf32> to vector<8x32xf32>
    %7 = arith.addf %4, %6 : vector<8x32xf32>
    %cst_5 = arith.constant dense<0.000000e+00> : vector<8xf32>
    %8 = vector.multi_reduction <add>, %7, %cst_5 [1] : vector<8x32xf32> to vector<8xf32>
    %9 = vector.shape_cast %8 : vector<8xf32> to vector<8x1xf32>
    %cst_6 = arith.constant 3.200000e+01 : f32
    %10 = vector.broadcast %cst_6 : f32 to vector<8x1xf32>
    %11 = arith.divf %9, %10 : vector<8x1xf32>
    %12 = arith.mulf %7, %7 : vector<8x32xf32>
    %cst_7 = arith.constant dense<0.000000e+00> : vector<8xf32>
    %13 = vector.multi_reduction <add>, %12, %cst_7 [1] : vector<8x32xf32> to vector<8xf32>
    %14 = vector.shape_cast %13 : vector<8xf32> to vector<8x1xf32>
    %cst_8 = arith.constant 3.200000e+01 : f32
    %15 = vector.broadcast %cst_8 : f32 to vector<8x1xf32>
    %16 = arith.divf %14, %15 : vector<8x1xf32>
    %17 = arith.mulf %11, %11 : vector<8x1xf32>
    %18 = arith.subf %16, %17 : vector<8x1xf32>
    %cst_9 = arith.constant 0.000000e+00 : f32
    %19 = vector.broadcast %cst_9 : f32 to vector<8x1xf32>
    %20 = arith.maximumf %18, %19 : vector<8x1xf32>
    %cst_10 = arith.constant 9.99999974E-6 : f32
    %21 = vector.broadcast %cst_10 : f32 to vector<8x1xf32>
    %22 = arith.addf %20, %21 : vector<8x1xf32>
    %23 = math.rsqrt %22 : vector<8x1xf32>
    %24 = vector.broadcast %11 : vector<8x1xf32> to vector<8x32xf32>
    %25 = arith.subf %7, %24 : vector<8x32xf32>
    %26 = vector.broadcast %23 : vector<8x1xf32> to vector<8x32xf32>
    %27 = arith.mulf %25, %26 : vector<8x32xf32>
    %c0_11 = arith.constant 0 : index
    %c0_12 = arith.constant 0 : index
    %28 = vector.load %arg4[%c0_11, %c0_12] : memref<1x32xf32, #tpu.memory_space<vmem>>, vector<1x32xf32>
    %29 = vector.broadcast %28 : vector<1x32xf32> to vector<8x32xf32>
    %30 = arith.mulf %27, %29 : vector<8x32xf32>
    %c0_13 = arith.constant 0 : index
    %c0_14 = arith.constant 0 : index
    %31 = vector.load %arg5[%c0_13, %c0_14] : memref<1x32xf32, #tpu.memory_space<vmem>>, vector<1x32xf32>
    %32 = vector.broadcast %31 : vector<1x32xf32> to vector<8x32xf32>
    %33 = arith.addf %30, %32 : vector<8x32xf32>
    %c0_15 = arith.constant 0 : index
    %c0_16 = arith.constant 0 : index
    %34 = vector.load %arg6[%c0_15, %c0_16] : memref<8x32xf32, #tpu.memory_space<vmem>>, vector<8x32xf32>
    tpu.vector_store %arg6[%c0_15, %c0_16], %33 {strides = array<i32>} : memref<8x32xf32, #tpu.memory_space<vmem>>, vector<8x32xf32>,
    return
  }
  func.func @transform_0(%arg0: i32) -> (i32, i32) {
    %c0_i32 = arith.constant 0 : i32
    %c0_i32_0 = arith.constant 0 : i32
    return %arg0, %c0_i32 : i32, i32
  }
  func.func @transform_1(%arg0: i32) -> (i32, i32) {
    %c0_i32 = arith.constant 0 : i32
    %c0_i32_0 = arith.constant 0 : i32
    %c0_i32_1 = arith.constant 0 : i32
    return %c0_i32, %c0_i32_0 : i32, i32
  }
  func.func @transform_2(%arg0: i32) -> (i32, i32) {
    %c0_i32 = arith.constant 0 : i32
    %c0_i32_0 = arith.constant 0 : i32
    %c0_i32_1 = arith.constant 0 : i32
    return %c0_i32, %c0_i32_0 : i32, i32
  }
  func.func @transform_3(%arg0: i32) -> (i32, i32) {
    %c0_i32 = arith.constant 0 : i32
    %c0_i32_0 = arith.constant 0 : i32
    %c0_i32_1 = arith.constant 0 : i32
    return %c0_i32, %c0_i32_0 : i32, i32
  }
  func.func @transform_4(%arg0: i32) -> (i32, i32) {
    %c0_i32 = arith.constant 0 : i32
    %c0_i32_0 = arith.constant 0 : i32
    %c0_i32_1 = arith.constant 0 : i32
    return %c0_i32, %c0_i32_0 : i32, i32
  }
  func.func @transform_5(%arg0: i32) -> (i32, i32) {
    %c0_i32 = arith.constant 0 : i32
    %c0_i32_0 = arith.constant 0 : i32
    return %arg0, %c0_i32 : i32, i32
  }
}

</mosaic_0001>

<bundles_post_ra>
// kernel: tpu_custom_call.1
= control target key start
LH: loop header
LB: loop body
LE: loop exit
PB: predicated region body
PF: predicated region fallthrough
CT: control target
= control target key end

     0   :  { %10 = vsyncpa [#allocation3], 0  ;;  %s829_s0 = inlined_call_operand.hbm [shape: f32[16,32], index: 0, kind: input, shape index: {}]   ;;  %s830_s1 = inlined_call_operand.hbm [shape: f32[32,32], index: 1, kind: input, shape index: {}]   ;;  %s831_s2 = inlined_call_operand.vmem [shape: f32[1,32], index: 2, kind: input, shape index: {}]   ;;  %s832_s3 = inlined_call_operand.vmem [shape: f32[1,32], index: 3, kind: input, shape index: {}]   ;;  %s833_s4 = inlined_call_operand.vmem [shape: f32[1,32], index: 4, kind: input, shape index: {}]   ;;  %s834_s5 = inlined_call_operand.hbm [shape: f32[16,32], index: 5, kind: output, shape index: {}]  }
   0x1   :  { %12 = vsyncpa [#allocation3 + $0x1], 0 }
   0x2   :  { %13 = vsyncpa [#allocation6], 0 }
   0x3   :  { %14 = vsyncpa [#allocation4], 0 }
   0x4   :  { %16 = vsyncpa [#allocation4 + $0x1], 0  ;;  %s676_s18 = smov 0   ;;  %s678_s19 = smov 0  }
   0x5   :  { %s680_s20 = smov 0   ;;  %s682_s21 = smov 0  }
   0x6 LB: > { %s174_s24 = sshll.u32 %s830_s1, 4  ;;  %s700_s25 = sadd.s32 4294967295, %s640_s21   ;;  %s640_s21 = sphi %s682_s21, %s844_s21   ;;  %s636_s20 = sphi %s680_s20, %s843_s20   ;;  %s632_s19 = sphi %s678_s19, %s842_s19   ;;  %s628_s18 = sphi %s676_s18, %s841_s18   ;;  %s175_s24 = int_to_ptr.hbm [resolvable:$true] %s174_s24 }
   0x7   : > { %p429_p0 = scmp.ge.s32.totalorder %s640_s21, 1  ;;  %p43_p1 = scmp.eq.s32.totalorder %s700_s25, 0 }
   0x8   : > { %p163_p2 = scmp.lt.s32.totalorder %s640_s21, 3  ;;  %s642_s27 = smov [#allocation5]  }
   0x9   : > { %s176_s28 = sshll.u32 %s642_s27, 4  ;;  %s643_s29 = smov 128   ;;  %s177_s28 = int_to_ptr.vmem [resolvable:$true] %s176_s28 }
   0xa   : > { %p705_p3 = pnand %p429_p0, %p163_p2  ;;  %s644_s30 = smov 8  }
   0xb   : > { %s428_s6 = sadd.s32 4294967294, %s640_s21   ;;  %s716_s7 = sadd.s32 1, %s640_s21  }
   0xc   : > { %p451_p4 = pneg %p705_p3  ;;  %s29_s8 = sadd.s32 1, %s636_s20 }
   0xd   : > { %s26_s9 = ssub.s32 %s640_s21, %s716_s7  ;;  %p36_p7 = scmp.ne.s32.totalorder %s636_s20, %s632_s19 }
   0xe   : > { %p452_p6 = pnand %p451_p4, %p43_p1  ;;  %p27_p8 = scmp.eq.s32.totalorder %s26_s9, 0 }
   0xf   : > { %p37_p9 = scmp.eq.s32.totalorder %s640_s21, 0  ;;  %p42_p10 = scmp.ne.s32.totalorder %s632_s19, %s628_s18 }
  0x10   : > { %454 = dma.hbm_to_vmem [thread:$0]  (!%p452_p6), %s175_s24, 512, %s177_s28, [#allocation6], %s643_s29, %s643_s29, %s644_s30  }
  0x11   : > { %p150_p11 = scmp.eq.s32.totalorder %s700_s25, 1  ;;  %p732_p12 = por %p43_p1, %p42_p10 }
  0x12   : > { %s728_s10 = scalar_select %p27_p8, %s636_s20, %s29_s8  }
  0x13   : > { %p736_p13 = por %p150_p11, %p36_p7  ;;  %p156_p0 = scmp.eq.s32.totalorder %s428_s6, 1 }
  0x14   : > { %p38_p2 = por %p37_p9, %p36_p7  ;;  %s199_s13 = sand.u32 1, %s636_s20  }
  0x15   : > { %p741_p4 = por %p156_p0, %p42_p10  ;;  %p464_p6 = scmp.lt.s32.totalorder %s640_s21, 2 }
  0x16   : > { %s432_s15 = sshll.u32 %s199_s13, 3  ;;  %s433_s16 = sshll.u32 %s640_s21, 3 }
  0x17   : > { %s207_s23 = scalar_lea.hbm %s829_s0, %s433_s16  ;;  %s203_s27 = scalar_lea.vmem [#allocation2], %s432_s15 }
  0x18   : > { %s209_s24 = sshll.u32 %s207_s23, 4  ;;  %s211_s28 = sshll.u32 %s203_s27, 4  ;;  %s210_s24 = int_to_ptr.hbm [resolvable:$true] %s209_s24  ;;  %s212_s28 = int_to_ptr.vmem [resolvable:$true] %s211_s28 }
  0x19   : > { %p750_p8 = pnand %p464_p6, %p38_p2  ;;  %s200_s30 = scalar_lea.sflag [#allocation3], %s199_s13 }
  0x1a   : > { %s540_s6 = sshra.s32 %s210_s24, 4  ;;  %s547_s15 = scalar_lea.hbm %s829_s0, 16  ;;  %s541_s6 = int_to_ptr.hbm [resolvable:$true] %s540_s6 }
  0x1b   : > { %s542_s8 = scalar_lea.hbm %s541_s6, 8  ;;  %p544_p9 = pneg %p750_p8 }
  0x1c   : > { %p543_p7 = scmp.ne.s32.totalorder %s541_s6, %s542_s8  ;;  %p548_p0 = scmp.lt.s32.totalorder %s541_s6, %s829_s0 }
  0x1d   : > { %p549_p2 = scmp.lt.s32.totalorder %s547_s15, %s542_s8 }
  0x1e   : > { %p545_p10 = pnand %p544_p9, %p543_p7 }
  0x1f   : > { %p550_p6 = por %p549_p2, %p548_p0 }
  0x20   : > { %p546_p11 = pneg %p545_p10 }
  0x22   : > { %p551_p5 = pnand %p550_p6, %p546_p11 }
  0x24   : > { %554 = shalt.err (!%p551_p5)
}
  0x25   : > { %458 = dma.hbm_to_vmem [thread:$0]  (!%p750_p8), %s210_s24, 128, %s212_s28, %s200_s30  }
  0x26   : > { %220 = sbr.rel (%p705_p3) target bundleno = 344 (0x158), region = 40  ;;  %s767_s13 = sand.u32 (!%p705_p3), 1, %s632_s19  }
  0x27   : > { %s435_s23 = sshll.u32 (!%p705_p3), %s767_s13, 3  ;;  %s223_s27 = scalar_lea.sflag (!%p705_p3), [#allocation3], %s767_s13 }
  0x28   : > { %s226_s6 = scalar_lea.vmem (!%p705_p3), [#allocation2], %s435_s23 }
  0x2b   : > { %615 = dma.done.wait (%p732_p12), %s223_s27, 128  }
  0x2c   : > { %617 = vsyncadd (%p732_p12), %s223_s27, 4294967168 }
  0x2d   : > { %619 = dma.done.wait (%p43_p1), [#allocation6], 512  }
  0x2e   : > { %621 = vsyncadd (%p43_p1), [#allocation6], 4294966784  ;;  %v264_v0 = vld [vmem:[#allocation5 + $0x10] sm:$0xff]  ;;  %v265_v1 = vld [vmem:[#allocation5 + $0x18] sm:$0xff]  ;;  %vm272_vm0 = vcmask 261120   ;;  %v645_v15 = vmov 32.0  }
  0x2f   : > { %v262_v2 = vld [vmem:[#allocation5] sm:$0xff]  ;;  %v267_v3 = vpack.c.bf16 %v265_v1, %v264_v0  ;;  %v263_v4 = vld [vmem:[#allocation5 + $0x8] sm:$0xff]  ;;  %v260_v6 = vld [vmem:[%s226_s6] sm:$0xff]  ;;  %506 = vrcp.f32 %v645_v15  ;;  %s440_s24 = sshll.u32 %s700_s25, 3  ;;  %s258_s25 = scalar_lea.vmem [#allocation7], %s435_s23 }
  0x30   : > { %v266_v5 = vpack.c.bf16 %v263_v4, %v262_v2  ;;  %v261_v7 = vpack.c.bf16 %v260_v6, %v260_v6  ;;  %v503_v8 = vld [vmem:[%s831_s2] ss:$0 sm:$0xff]  ;;  %s343_s9 = scalar_lea.hbm %s834_s5, %s440_s24  ;;  %s345_s17 = sshll.u32 %s258_s25, 4  ;;  %s346_s17 = int_to_ptr.vmem [resolvable:$true] %s345_s17 }
  0x31   : > { %282 = vmatpush.bf16.msra.mxu0 %v267_v3  ;;  %v504_v37 = vld [vmem:[%s832_s3] ss:$0 sm:$0xff]  ;;  %s347_s22 = sshll.u32 %s343_s9, 4  ;;  %s333_s27 = scalar_lea.sflag [#allocation4], %s767_s13  ;;  %s348_s22 = int_to_ptr.hbm [resolvable:$true] %s347_s22 }
  0x32   : > { %v505_v40 = vld [vmem:[%s833_s4] ss:$0 sm:$0xff]  ;;  %s584_s6 = sshra.s32 %s348_s22, 4  ;;  %s590_s23 = scalar_lea.hbm %s834_s5, 16  ;;  %s585_s6 = int_to_ptr.hbm [resolvable:$true] %s584_s6 }
  0x33   : > { %s586_s26 = scalar_lea.hbm %s585_s6, 8  ;;  %p591_p12 = scmp.lt.s32.totalorder %s585_s6, %s834_s5 }
  0x34   : > { %p587_p1 = scmp.ne.s32.totalorder %s585_s6, %s586_s26  ;;  %p592_p8 = scmp.lt.s32.totalorder %s590_s23, %s586_s26 }
  0x35   : > { %283 = vmatpush.bf16.msra.mxu0 %v266_v5  ;;  %v507_v16 = vpop.eup %506 }
  0x36   : > { %v293_v17 = vmul.f32 32.0, %v507_v16  ;;  %vm297_vm1 = vweird.f32 %v507_v16  ;;  %p588_p3 = pnand %p587_p1, %p736_p13  ;;  %p593_p7 = por %p592_p8, %p591_p12 }
  0x38   : > { %438 = vmatmul.msk.bf16.vlgmr.msra.gmra.mxu0 %vm272_vm0, %v261_v7  ;;  %v294_v18 = vsub.f32 1.0, %v293_v17  ;;  %p589_p5 = pneg %p588_p3 }
  0x3a   : > { %v295_v19 = vmul.f32 %v507_v16, %v294_v18  ;;  %p594_p9 = pnand %p593_p7, %p589_p5 }
  0x3c   : > { %v296_v20 = vadd.f32 %v507_v16, %v295_v19 }
  0x3e   : > { %v298_v22 = vsel %vm297_vm1, %v507_v16, %v296_v20 }
  0xb5   : > { %v285_v9 = vpop.f32.mrf.mxu0 }
  0xb6   : > { %v286_v10 = vadd.f32 %v503_v8, %v285_v9 }
  0xb8   : > { %v289_v11 = vsel %vm272_vm0, %v286_v10, 0.0  ;;  %v300_v12 = vmul.f32 %v286_v10, %v286_v10 }
  0xb9   : > { %290 = vadd.xlane.f32.xlu0 %v289_v11 }
  0xba   : > { %v301_v14 = vsel %vm272_vm0, %v300_v12, 0.0 }
  0xbd   : > { %v287_v13 = vpop.f32.mrf.mxu0 }
  0xc1   : > { %302 = vadd.xlane.f32.xlu0 %v301_v14 }
 0x12c   : > { %v291_v21 = vpop.xlane.xlu0 %290 }
 0x12d   : > { %v299_v23 = vmul.f32 %v298_v22, %v291_v21 }
 0x12f   : > { %v305_v25 = vmul.f32 %v299_v23, %v299_v23  ;;  %v319_v36 = vsub.f32 %v286_v10, %v299_v23 }
 0x134   : > { %v303_v24 = vpop.xlane.xlu0 %302 }
 0x135   : > { %v304_v26 = vmul.f32 %v303_v24, %v298_v22 }
 0x137   : > { %v306_v27 = vsub.f32 %v304_v26, %v305_v25 }
 0x139   : > { %v307_v28 = vmax.f32 %v306_v27, 0.0 }
 0x13b   : > { %v308_v29 = vadd.f32 1e-05, %v307_v28 }
 0x13d   : > { %508 = vrsqrt.f32 %v308_v29  ;;  %vm315_vm3 = vweird.f32 %v308_v29 }
 0x143   : > { %v509_v30 = vpop.eup %508 }
 0x144   : > { %v310_v31 = vmul.f32 %v509_v30, %v308_v29  ;;  %vm316_vm2 = vweird.f32 %v509_v30 }
 0x145   : > { %vm317_vm4 = vmor %vm315_vm3, %vm316_vm2 }
 0x146   : > { %v311_v32 = vmul.f32 %v509_v30, %v310_v31 }
 0x148   : > { %v312_v33 = vmul.f32 0.5, %v311_v32 }
 0x14a   : > { %v313_v34 = vsub.f32 1.5, %v312_v33 }
 0x14c   : > { %v314_v35 = vmul.f32 %v509_v30, %v313_v34 }
 0x14e   : > { %v318_v38 = vsel %vm317_vm4, %v509_v30, %v314_v35 }
 0x14f   : > { %v320_v39 = vmul.f32 %v319_v36, %v318_v38 }
 0x151   : > { %v325_v41 = vmul.f32 %v504_v37, %v320_v39 }
 0x153   : > { %v330_v42 = vadd.f32 %v505_v40, %v325_v41 }
 0x155   : > { %331 = vst.msk [vmem:[%s258_s25] sm:$0xff] %vm272_vm0, %v330_v42 }
 0x156   : > { %597 = shalt.err (!%p594_p9)
}
 0x157   : > { %449 = dma.vmem_to_hbm [thread:$0]  (%p736_p13), %s346_s17, 128, %s348_s22, %s333_s27  }
 0x158 PF: > { %s359_s13 = sand.u32 1, %s628_s18   ;;  %p840_p10 = scmp.ge.s32.totalorder %s640_s21, 2 }
 0x159   : > { %s360_s30 = scalar_lea.sflag [#allocation4], %s359_s13 }
 0x15a   : > { %p460_p11 = pnand %p840_p10, %p741_p4 }
 0x15c   : > { %p461_p0 = pneg %p460_p11 }
 0x15e   : > { %623 = dma.done.wait (%p461_p0), %s360_s30, 128  }
 0x15f   : > { %625 = vsyncadd (%p461_p0), %s360_s30, 4294967168  ;;  %p19_p2 = scmp.ge.s32.totalorder %s716_s7, 4   ;;  %s841_s18 = smov %s632_s19 }
 0x160   : > { %s842_s19 = smov %s636_s20  ;;  %s843_s20 = smov %s728_s10 }
 0x161   : > { %s844_s21 = smov %s716_s7  ;;  %21 = sbr.rel (!%p19_p2) target bundleno = 6 (0x6), region = 89 }
 0x166   :  { %366 = vsyncpa [#allocation3], 1 }
 0x167   :  { %368 = vsyncpa [#allocation3 + $0x1], 1 }
 0x168   :  { %369 = vsyncpa [#allocation6], 1 }
 0x169   :  { %370 = vsyncpa [#allocation4], 1 }
 0x16a   :  { %372 = vsyncpa [#allocation4 + $0x1], 1 }

</bundles_post_ra>
